<compile_context>
chip_gen: v7x
topology: tpu7x:2x2x1
jax: 0.10.0
libtpu: 0.0.40
codegen_flags: <defaults>
</compile_context>

<pallas_src>
import math

import jax
import jax.numpy as jnp
from jax.experimental import pallas as pl
from jax.experimental.pallas import tpu as pltpu


def _attention_kernel(h_ref, enc_ref, wh_ref, we_ref, b_ref, v_ref, out_ref):
    # h_ref:   [B, 1, H]  last RNN hidden state per batch element
    # enc_ref: [B, S, H]  encoder outputs, batch-major
    # wh_ref:  [H, H]     attn weight, hidden half, pre-transposed
    # we_ref:  [H, H]     attn weight, encoder half, pre-transposed
    # b_ref:   [1, 1, H]  attn bias
    # v_ref:   [1, 1, H]  scoring vector
    # out_ref: [B, S]     softmax attention weights (softmax over S, the lane axis)
    B, S, H = enc_ref.shape

    # Split-weight formulation: concat([h, enc], -1) @ W.T == h @ Wh.T + enc @ We.T.
    # Broadcast the (tiny) weights over the batch dim once so both contractions are
    # canonical batched MXU matmuls (same pattern as flash-attention einsums).
    we_b = jnp.broadcast_to(we_ref[...][None], (B, H, H))
    wh_b = jnp.broadcast_to(wh_ref[...][None], (B, H, H))
    ee = jnp.einsum("bsh,bhk->bsk", enc_ref[...], we_b,
                    preferred_element_type=jnp.float32)            # [B, S, H]
    he = jnp.einsum("bih,bhk->bik", h_ref[...], wh_b,
                    preferred_element_type=jnp.float32)            # [B, 1, H]

    # Broadcast-add the per-batch hidden contribution and bias, then tanh (EUP).
    energy = jnp.tanh(ee + he + b_ref[...])                        # [B, S, H]

    # v-scoring: VPU multiply + lane reduction instead of an N=1 MXU matvec.
    # Result is directly the lane-dense [B, S] layout the output store wants.
    scores = jnp.sum(energy * v_ref[...], axis=-1)                 # [B, S]

    # Numerically stable softmax over the seq (lane) axis. Exact divide (no
    # approx reciprocal) to stay within the 1e-5 tolerance.
    m = jnp.max(scores, axis=-1, keepdims=True)
    ex = jnp.exp(scores - m)
    out_ref[...] = (ex / jnp.sum(ex, axis=-1, keepdims=True)).astype(out_ref.dtype)


def attention_forward(hidden, encoder_outputs, w, b, v):
    """hidden: [L, B, H]; encoder_outputs: [S, B, H]; w: [H, 2H]; b: [H]; v: [H].
    Returns softmax attention weights [B, S] (softmax over dim=1, the seq axis)."""
    L, B, H = hidden.shape
    S = encoder_outputs.shape[0]

    # Cheap XLA glue: batch-major views and the one-time weight split/transpose.
    # No [B, S, 2H] concat is ever materialized.
    h3 = hidden[-1][:, None, :]                        # [B, 1, H]
    enc3 = jnp.transpose(encoder_outputs, (1, 0, 2))   # [B, S, H]
    wh_t = w[:, :H].T                                  # [H, H]  (hidden half)
    we_t = w[:, H:].T                                  # [H, H]  (encoder half)
    b3 = b.reshape(1, 1, H)
    v3 = v.reshape(1, 1, H)

    vmem_spec = pl.BlockSpec(memory_space=pltpu.MemorySpace.VMEM)
    out = pl.pallas_call(
        _attention_kernel,
        out_shape=jax.ShapeDtypeStruct((B, S), jnp.float32),
        in_specs=[vmem_spec] * 6,
        out_specs=vmem_spec,
    )(h3, enc3, wh_t, we_t, b3, v3)

    return out                                         # [B, S]


if __name__ == "__main__":
    # Small shapes consistent with the module: hidden_size=32, batch=2, seq=8, layers=2.
    H, B, S, L = 32, 2, 8, 2
    key = jax.random.PRNGKey(0)
    k1, k2, k3, k4, k5 = jax.random.split(key, 5)

    # Deterministic parameter init (nn.Linear-style uniform; v ~ N(0, 1/sqrt(H))).
    bound = 1.0 / math.sqrt(2.0 * H)
    w = jax.random.uniform(k1, (H, 2 * H), jnp.float32, -bound, bound)   # attn.weight
    bias = jax.random.uniform(k2, (H,), jnp.float32, -bound, bound)      # attn.bias
    v = jax.random.normal(k3, (H,), jnp.float32) * (1.0 / math.sqrt(H))  # self.v

    hidden = jax.random.normal(k4, (L, B, H), jnp.float32)
    encoder_outputs = jax.random.normal(k5, (S, B, H), jnp.float32)

    out = attention_forward(hidden, encoder_outputs, w, bias, v)
    out = jax.block_until_ready(out)

    # Pure-JAX reference (mirrors the PyTorch forward exactly).
    h_rep_ref = jnp.broadcast_to(hidden[-1][None], (S, B, H))
    energy_ref = jnp.tanh(
        jnp.concatenate([h_rep_ref, encoder_outputs], axis=2) @ w.T + bias)  # [S,B,H]
    scores_ref = jnp.einsum("sbh,h->bs", energy_ref, v)                      # [B,S]
    ref = jax.nn.softmax(scores_ref, axis=1)

    assert out.shape == (B, S), out.shape
    assert jnp.allclose(out, ref, atol=1e-5, rtol=1e-5), (out, ref)
    print("KERNEL_OK")
</pallas_src>

<mosaic_0001>
module attributes {stable_mosaic.version = 11 : i64} {
  func.func @_attention_kernel(%arg0: memref<2x1x32xf32, #tpu.memory_space<vmem>>, %arg1: memref<2x8x32xf32, #tpu.memory_space<vmem>>, %arg2: memref<32x32xf32, #tpu.memory_space<vmem>>, %arg3: memref<32x32xf32, #tpu.memory_space<vmem>>, %arg4: memref<1x1x32xf32, #tpu.memory_space<vmem>>, %arg5: memref<1x1x32xf32, #tpu.memory_space<vmem>>, %arg6: memref<2x8xf32, #tpu.memory_space<vmem>>) attributes {dimension_semantics = [], scalar_prefetch = 0 : i64, scratch_operands = 0 : i64, tpu.core_type = #tpu.core_type<tc>} {
    %c0 = arith.constant 0 : index
    %c0_0 = arith.constant 0 : index
    %0 = vector.load %arg3[%c0, %c0_0] : memref<32x32xf32, #tpu.memory_space<vmem>>, vector<32x32xf32>
    %1 = vector.shape_cast %0 : vector<32x32xf32> to vector<1x32x32xf32>
    %2 = vector.shape_cast %1 : vector<1x32x32xf32> to vector<1x32x32xf32>
    %3 = vector.broadcast %2 : vector<1x32x32xf32> to vector<2x32x32xf32>
    %c0_1 = arith.constant 0 : index
    %c0_2 = arith.constant 0 : index
    %4 = vector.load %arg2[%c0_1, %c0_2] : memref<32x32xf32, #tpu.memory_space<vmem>>, vector<32x32xf32>
    %5 = vector.shape_cast %4 : vector<32x32xf32> to vector<1x32x32xf32>
    %6 = vector.shape_cast %5 : vector<1x32x32xf32> to vector<1x32x32xf32>
    %7 = vector.broadcast %6 : vector<1x32x32xf32> to vector<2x32x32xf32>
    %c0_3 = arith.constant 0 : index
    %c0_4 = arith.constant 0 : index
    %c0_5 = arith.constant 0 : index
    %8 = vector.load %arg1[%c0_3, %c0_4, %c0_5] : memref<2x8x32xf32, #tpu.memory_space<vmem>>, vector<2x8x32xf32>
    "tpu.trace_start"() <{level = 10 : i32, message = "bsh,bhk->bsk"}> : () -> ()
    %cst = arith.constant dense<0.000000e+00> : vector<2x8x32xf32>
    %9 = tpu.matmul %8, %3, %cst {dimension_numbers = #tpu.dot_dimension_numbers<[2], [1], [1], [2], [0, 0, 0, 1, 1, 2], [0], [0]>} : vector<2x8x32xf32>, vector<2x32x32xf32>, vector<2x8x32xf32> -> vector<2x8x32xf32>
    "tpu.trace_stop"() : () -> ()
    %c0_6 = arith.constant 0 : index
    %c0_7 = arith.constant 0 : index
    %c0_8 = arith.constant 0 : index
    %10 = vector.load %arg0[%c0_6, %c0_7, %c0_8] : memref<2x1x32xf32, #tpu.memory_space<vmem>>, vector<2x1x32xf32>
    "tpu.trace_start"() <{level = 10 : i32, message = "bih,bhk->bik"}> : () -> ()
    %cst_9 = arith.constant dense<0.000000e+00> : vector<2x1x32xf32>
    %11 = tpu.matmul %10, %7, %cst_9 {dimension_numbers = #tpu.dot_dimension_numbers<[2], [1], [1], [2], [0, 0, 0, 1, 1, 2], [0], [0]>} : vector<2x1x32xf32>, vector<2x32x32xf32>, vector<2x1x32xf32> -> vector<2x1x32xf32>
    "tpu.trace_stop"() : () -> ()
    %12 = vector.broadcast %11 : vector<2x1x32xf32> to vector<2x8x32xf32>
    %13 = arith.addf %9, %12 : vector<2x8x32xf32>
    %c0_10 = arith.constant 0 : index
    %c0_11 = arith.constant 0 : index
    %c0_12 = arith.constant 0 : index
    %14 = vector.load %arg4[%c0_10, %c0_11, %c0_12] : memref<1x1x32xf32, #tpu.memory_space<vmem>>, vector<1x1x32xf32>
    %15 = vector.broadcast %14 : vector<1x1x32xf32> to vector<2x8x32xf32>
    %16 = arith.addf %13, %15 : vector<2x8x32xf32>
    %17 = math.tanh %16 : vector<2x8x32xf32>
    %c0_13 = arith.constant 0 : index
    %c0_14 = arith.constant 0 : index
    %c0_15 = arith.constant 0 : index
    %18 = vector.load %arg5[%c0_13, %c0_14, %c0_15] : memref<1x1x32xf32, #tpu.memory_space<vmem>>, vector<1x1x32xf32>
    %19 = vector.broadcast %18 : vector<1x1x32xf32> to vector<2x8x32xf32>
    %20 = arith.mulf %17, %19 : vector<2x8x32xf32>
    %cst_16 = arith.constant dense<0.000000e+00> : vector<2x8xf32>
    %21 = vector.multi_reduction <add>, %20, %cst_16 [2] : vector<2x8x32xf32> to vector<2x8xf32>
    %cst_17 = arith.constant dense<0xFF800000> : vector<2xf32>
    %22 = vector.multi_reduction <maximumf>, %21, %cst_17 [1] : vector<2x8xf32> to vector<2xf32>
    %23 = vector.shape_cast %22 : vector<2xf32> to vector<2x1xf32>
    %24 = vector.broadcast %23 : vector<2x1xf32> to vector<2x8xf32>
    %25 = arith.subf %21, %24 : vector<2x8xf32>
    %26 = math.exp %25 : vector<2x8xf32>
    %cst_18 = arith.constant dense<0.000000e+00> : vector<2xf32>
    %27 = vector.multi_reduction <add>, %26, %cst_18 [1] : vector<2x8xf32> to vector<2xf32>
    %28 = vector.shape_cast %27 : vector<2xf32> to vector<2x1xf32>
    %29 = vector.broadcast %28 : vector<2x1xf32> to vector<2x8xf32>
    %30 = arith.divf %26, %29 : vector<2x8xf32>
    %c0_19 = arith.constant 0 : index
    %c0_20 = arith.constant 0 : index
    %31 = vector.load %arg6[%c0_19, %c0_20] : memref<2x8xf32, #tpu.memory_space<vmem>>, vector<2x8xf32>
    tpu.vector_store %arg6[%c0_19, %c0_20], %30 {strides = array<i32>} : memref<2x8xf32, #tpu.memory_space<vmem>>, vector<2x8xf32>,
    return
  }
}

</mosaic_0001>

<bundles_post_ra>
// kernel: tpu_custom_call.1
= control target key start
LH: loop header
LB: loop body
LE: loop exit
PB: predicated region body
PF: predicated region fallthrough
CT: control target
= control target key end

     0   :  { %11 = vsyncpa [#allocation3], 0  ;;  %s916_s0 = inlined_call_operand.hbm [shape: f32[2,1,32], index: 0, kind: input, shape index: {}]   ;;  %s917_s1 = inlined_call_operand.hbm [shape: f32[2,8,32], index: 1, kind: input, shape index: {}]   ;;  %s918_s2 = inlined_call_operand.hbm [shape: f32[32,32], index: 2, kind: input, shape index: {}]   ;;  %s919_s3 = inlined_call_operand.hbm [shape: f32[32,32], index: 3, kind: input, shape index: {}]   ;;  %s920_s4 = inlined_call_operand.vmem [shape: f32[1,1,32], index: 4, kind: input, shape index: {}]   ;;  %s921_s5 = inlined_call_operand.vmem [shape: f32[1,1,32], index: 5, kind: input, shape index: {}]   ;;  %s922_s6 = inlined_call_operand.hbm [shape: f32[2,8], index: 6, kind: output, shape index: {}]  }
   0x1   :  { %12 = vsyncpa [#allocation6], 0 }
   0x2   :  { %13 = vsyncpa [#allocation9], 0 }
   0x3   :  { %14 = vsyncpa [#allocation4], 0  ;;  %s765_s21 = smov [#allocation5]   ;;  %s647_s25 = scalar_lea.hbm %s917_s1, 256 }
   0x4   :  { %s32_s22 = sshll.u32 %s765_s21, 4  ;;  %p648_p0 = scmp.ne.s32.totalorder %s917_s1, %s647_s25  ;;  %s33_s22 = int_to_ptr.vmem [resolvable:$true] %s32_s22 }
   0x5   :  { %p651_p1 = scmp.lt.u32.totalorder %s647_s25, %s917_s1 }
   0x7   :  { %p653_p2 = pnand %p651_p1, %p648_p0 }
   0x9   :  { %656 = shalt.err (!%p653_p2)
}
   0xa   :  { %s657_s30 = scalar_lea.vmem %s33_s22, 256  ;;  %p662_p4 = scmp.lt.s32.totalorder %s33_s22, %s33_s22 }
   0xb   :  { %p658_p3 = scmp.ne.s32.totalorder %s33_s22, %s657_s30  ;;  %p663_p5 = scmp.lt.s32.totalorder %s657_s30, %s657_s30 }
   0xd   :  { %p664_p6 = por %p663_p5, %p662_p4 }
   0xf   :  { %p665_p7 = pnand %p664_p6, %p658_p3 }
  0x11   :  { %668 = shalt.err (!%p665_p7)
}
  0x12   :  { %s766_s7 = smov 128   ;;  %s767_s8 = smov 8  }
  0x13   :  { %38 = dma.hbm_to_vmem [thread:$0]  %s917_s1, 256, %s33_s22, [#allocation6], %s766_s7, %s766_s7, %s767_s8  }
  0x14   :  { %s768_s11 = smov [#allocation2]   ;;  %s669_s15 = scalar_lea.hbm %s916_s0, 32 }
  0x15   :  { %s20_s12 = sshll.u32 %s768_s11, 4  ;;  %p670_p8 = scmp.ne.s32.totalorder %s916_s0, %s669_s15  ;;  %s21_s12 = int_to_ptr.vmem [resolvable:$true] %s20_s12 }
  0x16   :  { %p673_p9 = scmp.lt.u32.totalorder %s669_s15, %s916_s0 }
  0x18   :  { %p675_p10 = pnand %p673_p9, %p670_p8 }
  0x1a   :  { %678 = shalt.err (!%p675_p10)
}
  0x1b   :  { %s679_s20 = scalar_lea.vmem %s21_s12, 32  ;;  %p684_p12 = scmp.lt.s32.totalorder %s21_s12, %s21_s12 }
  0x1c   :  { %p680_p11 = scmp.ne.s32.totalorder %s21_s12, %s679_s20  ;;  %p685_p13 = scmp.lt.s32.totalorder %s679_s20, %s679_s20 }
  0x1e   :  { %p686_p0 = por %p685_p13, %p684_p12 }
  0x20   :  { %p687_p1 = pnand %p686_p0, %p680_p11 }
  0x22   :  { %690 = shalt.err (!%p687_p1)
}
  0x23   :  { %s769_s1 = smov 16   ;;  %s770_s21 = smov 1  }
  0x24   :  { %26 = dma.hbm_to_vmem [thread:$0]  %s916_s0, 32, %s21_s12, [#allocation3], %s769_s1, %s769_s1, %s770_s21  }
  0x25   :  { %s771_s24 = smov [#allocation7]   ;;  %s772_s26 = smov [#allocation8]  }
  0x26   :  { %s44_s25 = sshll.u32 %s771_s24, 4  ;;  %s56_s27 = sshll.u32 %s772_s26, 4  ;;  %s45_s25 = int_to_ptr.vmem [resolvable:$true] %s44_s25  ;;  %s840_s27 = int_to_ptr.vmem [resolvable:$true] %s56_s27 }
  0x27   :  { %s691_s30 = scalar_lea.hbm %s918_s2, 512 }
  0x28   :  { %p692_p2 = scmp.ne.s32.totalorder %s918_s2, %s691_s30  ;;  %p695_p3 = scmp.lt.u32.totalorder %s691_s30, %s918_s2 }
  0x2a   :  { %p697_p4 = pnand %p695_p3, %p692_p2 }
  0x2c   :  { %700 = shalt.err (!%p697_p4)
}
  0x2d   :  { %s701_s0 = scalar_lea.vmem %s45_s25, 512  ;;  %p706_p6 = scmp.lt.s32.totalorder %s45_s25, %s45_s25 }
  0x2e   :  { %p702_p5 = scmp.ne.s32.totalorder %s45_s25, %s701_s0  ;;  %p707_p7 = scmp.lt.s32.totalorder %s701_s0, %s701_s0 }
  0x30   :  { %p708_p8 = por %p707_p7, %p706_p6 }
  0x32   :  { %p709_p9 = pnand %p708_p8, %p702_p5 }
  0x34   :  { %712 = shalt.err (!%p709_p9)
}
  0x35   :  { %50 = dma.hbm_to_vmem [thread:$0]  %s918_s2, 512, %s45_s25, [#allocation6], %s766_s7, %s766_s7, %s767_s8  }
  0x36   :  { %s713_s17 = scalar_lea.hbm %s919_s3, 512 }
  0x37   :  { %p714_p10 = scmp.ne.s32.totalorder %s919_s3, %s713_s17  ;;  %p717_p11 = scmp.lt.u32.totalorder %s713_s17, %s919_s3 }
  0x39   :  { %p719_p12 = pnand %p717_p11, %p714_p10 }
  0x3b   :  { %722 = shalt.err (!%p719_p12)
}
  0x3c   :  { %s723_s21 = scalar_lea.vmem %s840_s27, 512  ;;  %p728_p0 = scmp.lt.s32.totalorder %s840_s27, %s840_s27 }
  0x3d   :  { %p724_p13 = scmp.ne.s32.totalorder %s840_s27, %s723_s21  ;;  %p729_p1 = scmp.lt.s32.totalorder %s723_s21, %s723_s21 }
  0x3f   :  { %p730_p2 = por %p729_p1, %p728_p0 }
  0x41   :  { %p731_p3 = pnand %p730_p2, %p724_p13 }
  0x43   :  { %734 = shalt.err (!%p731_p3)
}
  0x44   :  { %62 = dma.hbm_to_vmem [thread:$0]  %s919_s3, 512, %s840_s27, [#allocation9], %s766_s7, %s766_s7, %s767_s8  }
  0x45   :  { %757 = dma.done.wait [#allocation3], 32  }
  0x46   :  { %758 = vsyncadd [#allocation3], 4294967264 }
  0x47   :  { %759 = dma.done.wait [#allocation6], 768  }
  0x48   :  { %760 = vsyncadd [#allocation6], 4294966528 }
  0x49   :  { %761 = dma.done.wait [#allocation9], 512  }
  0x4a   :  { %762 = vsyncadd [#allocation9], 4294966784  ;;  %v773_v0 = vmov 0.0|0.0   ;;  %vm774_vm0 = vmmov 0   ;;  %v775_v1 = vmov 0.0   ;;  %v83_v2 = vld [vmem:[#allocation7] sm:$0xff]  ;;  %v238_v18 = vlaneseq }
  0x4b   :  { %596 = vmatprep.subr.bf16.mxu0 %v773_v0  ;;  %602 = vmatprep.subr.bf16.mxu1 %v773_v0  ;;  %v84_v3 = vld [vmem:[#allocation7 + $0x8] sm:$0xff]  ;;  %v85_v4 = vld [vmem:[#allocation7 + $0x10] sm:$0xff]  ;;  %v86_v6 = vld [vmem:[#allocation7 + $0x18] sm:$0xff]  ;;  %vm91_vm1 = vcmask 261120   ;;  %vm430_vm2 = vcmask 1041409   ;;  %vm433_vm3 = vcmask 58368  }
  0x4c   :  { %560 = vmatprep.mubr.msk.f32.mxu0 %vm774_vm0, %v775_v1  ;;  %571 = vmatprep.mubr.msk.f32.mxu1 %vm774_vm0, %v775_v1  ;;  %v597_v5 = vpack.c.bf16 %v84_v3, %v83_v2  ;;  %v600_v7 = vpack.c.bf16 %v86_v6, %v85_v4  ;;  %v79_v8 = vld [vmem:[#allocation8] sm:$0xff]  ;;  %v80_v9 = vld [vmem:[#allocation8 + $0x8] sm:$0xff]  ;;  %v81_v13 = vld [vmem:[#allocation8 + $0x10] sm:$0xff]  ;;  %v885_v19 = vshrl.u32 %v238_v18, 7  ;;  %v421_v43 = vand.u32 127, %v238_v18 }
  0x4d   :  { %v89_v10 = vld [vmem:[#allocation2] sm:$0x1]  ;;  %v90_v11 = vld [vmem:[#allocation2 + $0x1] sm:$0x1]  ;;  %v609_v12 = vpack.c.bf16 %v80_v9, %v79_v8  ;;  %v82_v14 = vld [vmem:[#allocation8 + $0x18] sm:$0xff]  ;;  %v776_v51 = vmov 0  }
  0x4e   :  { %598 = vmatpush3.bf16.msra.mxu0 %v597_v5  ;;  %604 = vmatpush3.bf16.msra.mxu1 %v597_v5  ;;  %v612_v15 = vpack.c.bf16 %v82_v14, %v81_v13  ;;  %v87_v16 = vld [vmem:[#allocation5] sm:$0xff]  ;;  %v88_v17 = vld [vmem:[#allocation5 + $0x8] sm:$0xff]  ;;  %v240_v24 = vsub.s32 0, %v885_v19  ;;  %v530_v28 = vld [vmem:[%s920_s4] ss:$0 sm:$0xff]  ;;  %v424_v45 = vsub.s32 %v421_v43, %v885_v19  ;;  %v444_v52 = vsub.s32 1, %v885_v19 }
  0x4f   :  { %599 = vmatprep.subr.bf16.mxu0 %v773_v0  ;;  %605 = vmatprep.subr.bf16.mxu1 %v773_v0  ;;  %v531_v36 = vld [vmem:[%s921_s5] ss:$0 sm:$0xff]  ;;  %s777_s4 = smov [#allocation10]  }
  0x50   :  { %634 = vset.pattern.permute.xlu0 %v776_v51  ;;  %633 = vset.pattern.permute.xlu1 %v776_v51  ;;  %s515_s5 = sshll.u32 %s777_s4, 4  ;;  %s516_s5 = int_to_ptr.vmem [resolvable:$true] %s515_s5 }
  0x51   :  { %s735_s24 = scalar_lea.vmem %s516_s5, 32  ;;  %p740_p5 = scmp.lt.s32.totalorder %s516_s5, %s516_s5 }
  0x52   :  { %601 = vmatpush3.bf16.msra.mxu0 %v600_v7  ;;  %607 = vmatpush3.bf16.msra.mxu1 %v600_v7  ;;  %p736_p4 = scmp.ne.s32.totalorder %s516_s5, %s735_s24  ;;  %p741_p6 = scmp.lt.s32.totalorder %s735_s24, %s735_s24 }
  0x53   :  { %608 = vmatprep.subr.bf16.mxu0 %v773_v0  ;;  %614 = vmatprep.subr.bf16.mxu1 %v773_v0 }
  0x54   :  { %p742_p7 = por %p741_p6, %p740_p5 }
  0x55   :  { %561 = vmatmul.mubr.msk.f32.vlgmr.msra.gmra.mrb[0].mxu0 %vm91_vm1, %v89_v10  ;;  %572 = vmatmul.mubr.msk.f32.vlgmr.msra.gmra.mrb[0].mxu1 %vm91_vm1, %v90_v11 }
  0x56   :  { %610 = vmatpush3.bf16.msra.mxu0 %v609_v12  ;;  %616 = vmatpush3.bf16.msra.mxu1 %v609_v12  ;;  %p743_p8 = pnand %p742_p7, %p736_p4 }
  0x57   :  { %611 = vmatprep.subr.bf16.mxu0 %v773_v0  ;;  %617 = vmatprep.subr.bf16.mxu1 %v773_v0 }
  0x58   :  { %582 = vmatprep.mubr.msk.f32.mxu0 %vm774_vm0, %v775_v1  ;;  %593 = vmatprep.mubr.msk.f32.mxu1 %vm774_vm0, %v775_v1 }
  0x5a   :  { %613 = vmatpush3.bf16.msra.mxu0 %v612_v15  ;;  %619 = vmatpush3.bf16.msra.mxu1 %v612_v15 }
  0x5d   :  { %583 = vmatmul.mubr.msk.f32.vlgmr.msra.gmra.mrb[2].mxu0 %vm91_vm1, %v87_v16  ;;  %594 = vmatmul.mubr.msk.f32.vlgmr.msra.gmra.mrb[2].mxu1 %vm91_vm1, %v88_v17 }
 0x128   :  { %v161_v20 = vpop.f32.mrb[0].mxu0  ;;  %v234_v21 = vpop.f32.mrb[0].mxu1 }
 0x129   :  { %v562_v22 = vpop.f32.mrb[1].mxu0  ;;  %v573_v23 = vpop.f32.mrb[1].mxu1  ;;  %v245_v25 = vrot.slane %v234_v21, %v240_v24  ;;  %v241_v26 = vrot.slane %v161_v20, %v240_v24 }
 0x130   :  { %v315_v27 = vpop.f32.mrb[2].mxu0  ;;  %v388_v29 = vpop.f32.mrb[2].mxu1 }
 0x131   :  { %v316_v30 = vadd.f32 %v315_v27, %v241_v26  ;;  %v389_v31 = vadd.f32 %v388_v29, %v245_v25  ;;  %v584_v32 = vpop.f32.mrb[3].mxu0  ;;  %v595_v33 = vpop.f32.mrb[3].mxu1 }
 0x133   :  { %v399_v34 = vadd.f32 %v530_v28, %v316_v30  ;;  %v400_v35 = vadd.f32 %v530_v28, %v389_v31 }
 0x135   :  { %635 = vtanh.f32 %v399_v34 }
 0x136   :  { %637 = vtanh.f32 %v400_v35 }
 0x13f   :  { %v636_v37 = vpop.eup %635 }
 0x140   :  { %v638_v38 = vpop.eup %637  ;;  %v410_v39 = vmul.f32 %v636_v37, %v531_v36 }
 0x141   :  { %v411_v41 = vmul.f32 %v638_v38, %v531_v36 }
 0x142   :  { %v412_v40 = vsel %vm91_vm1, %v410_v39, 0.0 }
 0x143   :  { %413 = vadd.xlane.f32.xlu0 %v412_v40  ;;  %v415_v42 = vsel %vm91_vm1, %v411_v41, 0.0 }
 0x147   :  { %416 = vadd.xlane.f32.xlu0 %v415_v42 }
 0x1d0   :  { %v414_v44 = vpop.xlane.xlu0 %413 }
 0x1d1   :  { %v425_v47 = vrot.slane %v414_v44, %v424_v45 }
 0x1d4   :  { %v417_v46 = vpop.xlane.xlu0 %416 }
 0x1d5   :  { %v429_v48 = vrot.slane %v417_v46, %v424_v45 }
 0x1d7   :  { %v431_v49 = vsel %vm430_vm2, %v429_v48, %v425_v47 }
 0x1d8   :  { %v434_v50 = vsel %vm433_vm3, %v431_v49, -inf }
 0x1d9   :  { %435 = vmax.xlane.f32.xlu1 %v434_v50 }
 0x266   :  { %v436_v53 = vpop.xlane.xlu1 %435 }
 0x267   :  { %v441_v54 = vrot.slane %v436_v53, %v240_v24  ;;  %v445_v55 = vrot.slane %v436_v53, %v444_v52 }
 0x269   :  { %v448_v56 = vsub.f32 %v414_v44, %v441_v54  ;;  %v449_v57 = vsub.f32 %v417_v46, %v445_v55 }
 0x26b   :  { %v450_v58 = vmul.f32 1.442695, %v448_v56  ;;  %v452_v59 = vmul.f32 1.442695, %v449_v57 }
 0x26d   :  { %639 = vpow2.f32 %v450_v58 }
 0x26e   :  { %641 = vpow2.f32 %v452_v59 }
 0x277   :  { %v640_v60 = vpop.eup %639 }
 0x278   :  { %v642_v61 = vpop.eup %641  ;;  %457 = vperm.xlu1 %633, %v640_v60  }
 0x279   :  { %460 = vperm.xlu0 %634, %v642_v61  }
 0x2f7   :  { %v458_v62 = vpop.permute.xlu1 %457 }
 0x2f8   :  { %v461_v63 = vpop.permute.xlu0 %460  ;;  %v465_v0 = vrot.slane %v458_v62, %v424_v45 }
 0x2f9   :  { %v469_v1 = vrot.slane %v461_v63, %v424_v45 }
 0x2fb   :  { %v470_v2 = vsel %vm430_vm2, %v469_v1, %v465_v0 }
 0x2fc   :  { %v472_v3 = vsel %vm433_vm3, %v470_v2, 0.0 }
 0x2fd   :  { %473 = vadd.xlane.f32.xlu1 %v472_v3 }
 0x38a   :  { %v474_v4 = vpop.xlane.xlu1 %473 }
 0x38b   :  { %v479_v5 = vrot.slane %v474_v4, %v240_v24  ;;  %v483_v6 = vrot.slane %v474_v4, %v444_v52 }
 0x38d   :  { %643 = vrcp.f32 %v479_v5 }
 0x38e   :  { %645 = vrcp.f32 %v483_v6 }
 0x397   :  { %v644_v7 = vpop.eup %643 }
 0x398   :  { %v487_v8 = vmul.f32 %v644_v7, %v640_v60  ;;  %v646_v9 = vpop.eup %645 }
 0x399   :  { %v489_v10 = vmul.f32 %v646_v9, %v642_v61 }
 0x39a   :  { %493 = vperm.xlu0 %634, %v487_v8  }
 0x39e   :  { %496 = vperm.xlu0 %634, %v489_v10  }
 0x419   :  { %v494_v11 = vpop.permute.xlu0 %493 }
 0x41a   :  { %v501_v13 = vrot.slane %v494_v11, %v424_v45 }
 0x41d   :  { %v497_v12 = vpop.permute.xlu0 %496 }
 0x41e   :  { %v505_v14 = vrot.slane %v497_v12, %v424_v45 }
 0x420   :  { %v506_v15 = vsel %vm430_vm2, %v505_v14, %v501_v13 }
 0x421   :  { %508 = vst.msk [vmem:[#allocation10] sm:$0x3] %vm433_vm3, %v506_v15 }
 0x422   :  { %746 = shalt.err (!%p743_p8)
}
 0x423   :  { %s747_s27 = scalar_lea.hbm %s922_s6, 32 }
 0x424   :  { %p748_p9 = scmp.ne.s32.totalorder %s922_s6, %s747_s27  ;;  %p751_p10 = scmp.lt.u32.totalorder %s747_s27, %s922_s6 }
 0x426   :  { %p753_p11 = pnand %p751_p10, %p748_p9 }
 0x428   :  { %756 = shalt.err (!%p753_p11)
}
 0x429   :  { %518 = dma.vmem_to_hbm [thread:$0]  %s516_s5, 32, %s922_s6, [#allocation4]  }
 0x42a   :  { %763 = dma.done.wait [#allocation4], 32  }
 0x42b   :  { %764 = vsyncadd [#allocation4], 4294967264 }
 0x42c   :  { %522 = vsyncpa [#allocation3], 1 }
 0x42d   :  { %523 = vsyncpa [#allocation6], 1 }
 0x42e   :  { %524 = vsyncpa [#allocation9], 1 }
 0x42f   :  { %525 = vsyncpa [#allocation4], 1 }

</bundles_post_ra>
